<compile_context>
chip_gen: v7x
topology: tpu7x:2x2x1
jax: 0.10.0
libtpu: 0.0.40
codegen_flags: <defaults>
</compile_context>

<pallas_src>
import functools

import jax
import jax.numpy as jnp
from jax.experimental import pallas as pl
from jax.experimental.pallas import tpu as pltpu

LANE = 128
SUBLANE = 8


def _round_up(x, m):
    return (x + m - 1) // m * m


def _rnn_seq_kernel(
    h0_ref,     # (Bb, Hp)     initial hidden (read only at t == 0)
    x_ref,      # (Bb, Ip)     this timestep's input (time dim squeezed)
    wx_ref,     # (Ip, Hp+Op)  fused [i2h | i2o] weight rows acting on x
    wh_ref,     # (Hp, Hp+Op)  fused [i2h | i2o] weight rows acting on h
    b1_ref,     # (1,  Hp+Op)  fused [b_i2h | b_i2o]
    w2_ref,     # (Hp+Op, Op)  o2o weight (rows: [hidden' | out])
    b2_ref,     # (1,  Op)
    logp_ref,   # (Bb, Op)     output log-softmax for this timestep
    hid_ref,    # (Bb, Hp)     output final hidden (written at last step)
    h_scratch,  # (Bb, Hp)     VMEM recurrent state, persists across the grid
    *,
    o_logical,
):
    t = pl.program_id(1)

    @pl.when(t == 0)
    def _():
        h_scratch[...] = h0_ref[...]

    x = x_ref[...]
    h = h_scratch[...]

    # hidden' = i2h(cat(x, h)); out = i2o(cat(x, h)) -- fused into one
    # lane-wide result via split weights (no concat):  pre = [hidden' | out]
    pre = (
        jnp.dot(x, wx_ref[...], preferred_element_type=jnp.float32)
        + jnp.dot(h, wh_ref[...], preferred_element_type=jnp.float32)
        + b1_ref[...]
    )

    # out = o2o(cat(hidden', out)) == pre @ W2 + b2  (pre *is* the concat;
    # padded rows/cols of W2 are zero so padding contributes nothing)
    out2 = jnp.dot(pre, w2_ref[...], preferred_element_type=jnp.float32) + b2_ref[...]

    # dropout(p=0.1) is identity in eval mode.
    # TODO(synk): training-mode dropout (pltpu.prng_seed + prng_random_bits mask).

    # Numerically stable log_softmax over the logical output lanes only.
    if o_logical < out2.shape[-1]:
        lane = jax.lax.broadcasted_iota(jnp.int32, out2.shape, dimension=1)
        out2 = jnp.where(lane < o_logical, out2, jnp.float32(-1e30))
    m = jnp.max(out2, axis=1, keepdims=True)
    shifted = out2 - m
    logp_ref[...] = shifted - jnp.log(
        jnp.sum(jnp.exp(shifted), axis=1, keepdims=True)
    )

    h_new = pre[:, : h_scratch.shape[1]]
    h_scratch[...] = h_new

    @pl.when(t == pl.num_programs(1) - 1)
    def _():
        hid_ref[...] = h_new


def rnn_sequence(xs, h0, packed, *, batch_block=SUBLANE):
    """xs: (T, B, I) f32, h0: (B, H) f32 -> (log_probs (T, B, O), hidden (B, H))."""
    T, B, I = xs.shape
    H = h0.shape[1]
    I_, H_, O_, Ip, Hp, Op = packed["dims"]
    assert (I, H) == (I_, H_), "input shapes don't match packed params"

    Bp = _round_up(max(B, batch_block), batch_block)
    xs_p = jnp.zeros((T, Bp, Ip), jnp.float32).at[:, :B, :I].set(xs)
    h0_p = jnp.zeros((Bp, Hp), jnp.float32).at[:B, :H].set(h0)

    grid = (Bp // batch_block, T)
    kernel = functools.partial(_rnn_seq_kernel, o_logical=O_)

    resident = lambda b, t: (0, 0)  # weights/biases: stay in VMEM across the grid

    logp_p, hid_p = pl.pallas_call(
        kernel,
        out_shape=(
            jax.ShapeDtypeStruct((T, Bp, Op), jnp.float32),
            jax.ShapeDtypeStruct((Bp, Hp), jnp.float32),
        ),
        grid=grid,
        in_specs=[
            pl.BlockSpec((batch_block, Hp), lambda b, t: (b, 0)),            # h0
            pl.BlockSpec((None, batch_block, Ip), lambda b, t: (t, b, 0)),   # x_t
            pl.BlockSpec((Ip, Hp + Op), resident),                           # wx
            pl.BlockSpec((Hp, Hp + Op), resident),                           # wh
            pl.BlockSpec((1, Hp + Op), resident),                            # b1
            pl.BlockSpec((Hp + Op, Op), resident),                           # w2
            pl.BlockSpec((1, Op), resident),                                 # b2
        ],
        out_specs=(
            pl.BlockSpec((None, batch_block, Op), lambda b, t: (t, b, 0)),   # logp
            pl.BlockSpec((batch_block, Hp), lambda b, t: (b, 0)),            # hidden
        ),
        scratch_shapes=[pltpu.VMEM((batch_block, Hp), jnp.float32)],
        compiler_params=pltpu.CompilerParams(
            dimension_semantics=("parallel", "arbitrary"),
        ),
    )(h0_p, xs_p, packed["wx"], packed["wh"], packed["b1"], packed["w2"], packed["b2"])

    return logp_p[:, :B, :O_], hid_p[:B, :H]


def rnn_cell(x, h, packed):
    """Single RNN.forward step (same signature/semantics as the PyTorch module)."""
    logps, h_new = rnn_sequence(x[None, ...], h, packed)
    return logps[0], h_new


def init_params(key, input_size, hidden_size, output_size):
    """nn.Linear-style init (uniform +-1/sqrt(fan_in)); weights stored as (in, out)."""
    ks = jax.random.split(key, 6)

    def lin(kw, kb, fan_in, fan_out):
        bound = 1.0 / jnp.sqrt(jnp.float32(fan_in))
        w = jax.random.uniform(kw, (fan_in, fan_out), jnp.float32, -bound, bound)
        b = jax.random.uniform(kb, (fan_out,), jnp.float32, -bound, bound)
        return w, b

    w_i2h, b_i2h = lin(ks[0], ks[1], input_size + hidden_size, hidden_size)
    w_i2o, b_i2o = lin(ks[2], ks[3], input_size + hidden_size, output_size)
    w_o2o, b_o2o = lin(ks[4], ks[5], hidden_size + output_size, output_size)
    return {
        "w_i2h": w_i2h, "b_i2h": b_i2h,
        "w_i2o": w_i2o, "b_i2o": b_i2o,
        "w_o2o": w_o2o, "b_o2o": b_o2o,
    }


def pack_params(raw, input_size, hidden_size, output_size, lane=LANE):
    """Fuse i2h+i2o along lanes, split the x/h contraction rows, pad to 128 lanes."""
    I, H, O = input_size, hidden_size, output_size
    Ip, Hp, Op = _round_up(I, lane), _round_up(H, lane), _round_up(O, lane)

    wx = jnp.zeros((Ip, Hp + Op), jnp.float32)
    wx = wx.at[:I, :H].set(raw["w_i2h"][:I, :])
    wx = wx.at[:I, Hp:Hp + O].set(raw["w_i2o"][:I, :])

    wh = jnp.zeros((Hp, Hp + Op), jnp.float32)
    wh = wh.at[:H, :H].set(raw["w_i2h"][I:, :])
    wh = wh.at[:H, Hp:Hp + O].set(raw["w_i2o"][I:, :])

    b1 = jnp.zeros((1, Hp + Op), jnp.float32)
    b1 = b1.at[0, :H].set(raw["b_i2h"])
    b1 = b1.at[0, Hp:Hp + O].set(raw["b_i2o"])

    w2 = jnp.zeros((Hp + Op, Op), jnp.float32)
    w2 = w2.at[:H, :O].set(raw["w_o2o"][:H, :])
    w2 = w2.at[Hp:Hp + O, :O].set(raw["w_o2o"][H:, :])

    b2 = jnp.zeros((1, Op), jnp.float32)
    b2 = b2.at[0, :O].set(raw["b_o2o"])

    return {"wx": wx, "wh": wh, "b1": b1, "w2": w2, "b2": b2,
            "dims": (I, H, O, Ip, Hp, Op)}


def rnn_reference(xs, h0, raw):
    """Pure-JAX reference matching the PyTorch module (eval mode) exactly."""
    def step(h, x):
        xc = jnp.concatenate([x, h], axis=1)
        hidden = xc @ raw["w_i2h"] + raw["b_i2h"]
        out = xc @ raw["w_i2o"] + raw["b_i2o"]
        oc = jnp.concatenate([hidden, out], axis=1)
        out = oc @ raw["w_o2o"] + raw["b_o2o"]
        logp = jax.nn.log_softmax(out, axis=1)
        return hidden, logp

    h_final, logps = jax.lax.scan(step, h0, xs)
    return logps, h_final


if __name__ == "__main__":
    B, INPUT, HIDDEN, OUTPUT, T = 2, 32, 32, 32, 16

    key = jax.random.PRNGKey(0)
    k_params, k_x = jax.random.split(key)
    raw = init_params(k_params, INPUT, HIDDEN, OUTPUT)
    packed = pack_params(raw, INPUT, HIDDEN, OUTPUT)

    xs = jax.random.normal(k_x, (T, B, INPUT), jnp.float32)
    h0 = jnp.zeros((B, HIDDEN), jnp.float32)  # RNN.initHidden()

    log_probs, hidden = rnn_sequence(xs, h0, packed)
    jax.block_until_ready((log_probs, hidden))

    assert log_probs.shape == (T, B, OUTPUT) and hidden.shape == (B, HIDDEN)
    # log_softmax rows normalize to 1 in prob space
    assert jnp.allclose(jnp.sum(jnp.exp(log_probs), axis=-1), 1.0, atol=1e-4)

    # match the pure-JAX (cat + 3 Linears + log_softmax) reference of the module
    ref_logps, ref_hidden = rnn_reference(xs, h0, raw)
    assert jnp.allclose(log_probs, ref_logps, atol=2e-2, rtol=2e-2)
    assert jnp.allclose(hidden, ref_hidden, atol=2e-2, rtol=2e-2)

    # single-step API parity with RNN.forward
    lp1, h1 = rnn_cell(xs[0], h0, packed)
    jax.block_until_ready((lp1, h1))
    assert lp1.shape == (B, OUTPUT) and h1.shape == (B, HIDDEN)

    print("KERNEL_OK")
</pallas_src>

<mosaic_0001>
module attributes {stable_mosaic.version = 11 : i64} {
  func.func @_rnn_seq_kernel(%arg0: i32, %arg1: i32, %arg2: memref<8x128xf32, #tpu.memory_space<vmem>>, %arg3: memref<1x8x128xf32, #tpu.memory_space<vmem>>, %arg4: memref<128x256xf32, #tpu.memory_space<vmem>>, %arg5: memref<128x256xf32, #tpu.memory_space<vmem>>, %arg6: memref<1x256xf32, #tpu.memory_space<vmem>>, %arg7: memref<256x128xf32, #tpu.memory_space<vmem>>, %arg8: memref<1x128xf32, #tpu.memory_space<vmem>>, %arg9: memref<1x8x128xf32, #tpu.memory_space<vmem>>, %arg10: memref<8x128xf32, #tpu.memory_space<vmem>>, %arg11: memref<8x128xf32, #tpu.memory_space<vmem>>) attributes {dimension_semantics = [#tpu.dimension_semantics<parallel>, #tpu.dimension_semantics<arbitrary>], iteration_bounds = array<i64: 1, 16>, scalar_prefetch = 0 : i64, scratch_operands = 1 : i64, tpu.core_type = #tpu.core_type<tc>, window_params = [{transform_indices = @transform_0, window_bounds = array<i64: 8, 128>}, {transform_indices = @transform_1, window_bounds = array<i64: 1, 8, 128>}, {pipeline_mode = #tpu.pipeline_mode<synchronous>, transform_indices = @transform_2, window_bounds = array<i64: 128, 256>}, {pipeline_mode = #tpu.pipeline_mode<synchronous>, transform_indices = @transform_3, window_bounds = array<i64: 128, 256>}, {pipeline_mode = #tpu.pipeline_mode<synchronous>, transform_indices = @transform_4, window_bounds = array<i64: 1, 256>}, {pipeline_mode = #tpu.pipeline_mode<synchronous>, transform_indices = @transform_5, window_bounds = array<i64: 256, 128>}, {pipeline_mode = #tpu.pipeline_mode<synchronous>, transform_indices = @transform_6, window_bounds = array<i64: 1, 128>}, {transform_indices = @transform_7, window_bounds = array<i64: 1, 8, 128>}, {transform_indices = @transform_8, window_bounds = array<i64: 8, 128>}]} {
    %c0_i32 = arith.constant 0 : i32
    %0 = arith.cmpi eq, %arg1, %c0_i32 : i32
    %1 = arith.extui %0 : i1 to i32
    %c0_i32_0 = arith.constant 0 : i32
    %2 = arith.cmpi ne, %1, %c0_i32_0 : i32
    scf.if %2 {
      %c0_26 = arith.constant 0 : index
      %c0_27 = arith.constant 0 : index
      %42 = vector.load %arg2[%c0_26, %c0_27] : memref<8x128xf32, #tpu.memory_space<vmem>>, vector<8x128xf32>
      %c0_28 = arith.constant 0 : index
      %c0_29 = arith.constant 0 : index
      %43 = vector.load %arg11[%c0_28, %c0_29] : memref<8x128xf32, #tpu.memory_space<vmem>>, vector<8x128xf32>
      tpu.vector_store %arg11[%c0_28, %c0_29], %42 {strides = array<i32>} : memref<8x128xf32, #tpu.memory_space<vmem>>, vector<8x128xf32>,
    } else {
    }
    %c0 = arith.constant 0 : index
    %c0_1 = arith.constant 0 : index
    %c0_2 = arith.constant 0 : index
    %3 = vector.load %arg3[%c0, %c0_1, %c0_2] : memref<1x8x128xf32, #tpu.memory_space<vmem>>, vector<1x8x128xf32>
    %4 = vector.shape_cast %3 : vector<1x8x128xf32> to vector<8x128xf32>
    %c0_3 = arith.constant 0 : index
    %c0_4 = arith.constant 0 : index
    %5 = vector.load %arg11[%c0_3, %c0_4] : memref<8x128xf32, #tpu.memory_space<vmem>>, vector<8x128xf32>
    %c0_5 = arith.constant 0 : index
    %c0_6 = arith.constant 0 : index
    %6 = vector.load %arg4[%c0_5, %c0_6] : memref<128x256xf32, #tpu.memory_space<vmem>>, vector<128x256xf32>
    %cst = arith.constant dense<0.000000e+00> : vector<8x256xf32>
    %7 = tpu.matmul %4, %6, %cst {dimension_numbers = #tpu.dot_dimension_numbers<[1], [0], [0], [1], [0, 0, 1, 1], [], []>} : vector<8x128xf32>, vector<128x256xf32>, vector<8x256xf32> -> vector<8x256xf32>
    %c0_7 = arith.constant 0 : index
    %c0_8 = arith.constant 0 : index
    %8 = vector.load %arg5[%c0_7, %c0_8] : memref<128x256xf32, #tpu.memory_space<vmem>>, vector<128x256xf32>
    %cst_9 = arith.constant dense<0.000000e+00> : vector<8x256xf32>
    %9 = tpu.matmul %5, %8, %cst_9 {dimension_numbers = #tpu.dot_dimension_numbers<[1], [0], [0], [1], [0, 0, 1, 1], [], []>} : vector<8x128xf32>, vector<128x256xf32>, vector<8x256xf32> -> vector<8x256xf32>
    %10 = arith.addf %7, %9 : vector<8x256xf32>
    %c0_10 = arith.constant 0 : index
    %c0_11 = arith.constant 0 : index
    %11 = vector.load %arg6[%c0_10, %c0_11] : memref<1x256xf32, #tpu.memory_space<vmem>>, vector<1x256xf32>
    %12 = vector.broadcast %11 : vector<1x256xf32> to vector<8x256xf32>
    %13 = arith.addf %10, %12 : vector<8x256xf32>
    %c0_12 = arith.constant 0 : index
    %c0_13 = arith.constant 0 : index
    %14 = vector.load %arg7[%c0_12, %c0_13] : memref<256x128xf32, #tpu.memory_space<vmem>>, vector<256x128xf32>
    %cst_14 = arith.constant dense<0.000000e+00> : vector<8x128xf32>
    %15 = tpu.matmul %13, %14, %cst_14 {dimension_numbers = #tpu.dot_dimension_numbers<[1], [0], [0], [1], [0, 0, 1, 1], [], []>} : vector<8x256xf32>, vector<256x128xf32>, vector<8x128xf32> -> vector<8x128xf32>
    %c0_15 = arith.constant 0 : index
    %c0_16 = arith.constant 0 : index
    %16 = vector.load %arg8[%c0_15, %c0_16] : memref<1x128xf32, #tpu.memory_space<vmem>>, vector<1x128xf32>
    %17 = vector.broadcast %16 : vector<1x128xf32> to vector<8x128xf32>
    %18 = arith.addf %15, %17 : vector<8x128xf32>
    %19 = tpu.iota {dimensions = array<i32: 1>} : vector<8x128xi32>
    %c32_i32 = arith.constant 32 : i32
    %20 = vector.broadcast %c32_i32 : i32 to vector<8x128xi32>
    %21 = arith.cmpi slt, %19, %20 : vector<8x128xi32>
    %cst_17 = arith.constant -1.000000e+30 : f32
    %22 = vector.broadcast %cst_17 : f32 to vector<8x128xf32>
    %23 = arith.select %21, %18, %22 : vector<8x128xi1>, vector<8x128xf32>
    %cst_18 = arith.constant dense<0xFF800000> : vector<8xf32>
    %24 = vector.multi_reduction <maximumf>, %23, %cst_18 [1] : vector<8x128xf32> to vector<8xf32>
    %25 = vector.shape_cast %24 : vector<8xf32> to vector<8x1xf32>
    %26 = vector.broadcast %25 : vector<8x1xf32> to vector<8x128xf32>
    %27 = arith.subf %23, %26 : vector<8x128xf32>
    %28 = math.exp %27 : vector<8x128xf32>
    %cst_19 = arith.constant dense<0.000000e+00> : vector<8xf32>
    %29 = vector.multi_reduction <add>, %28, %cst_19 [1] : vector<8x128xf32> to vector<8xf32>
    %30 = vector.shape_cast %29 : vector<8xf32> to vector<8x1xf32>
    %31 = math.log %30 : vector<8x1xf32>
    %32 = vector.broadcast %31 : vector<8x1xf32> to vector<8x128xf32>
    %33 = arith.subf %27, %32 : vector<8x128xf32>
    %c0_20 = arith.constant 0 : index
    %c0_21 = arith.constant 0 : index
    %c0_22 = arith.constant 0 : index
    %34 = vector.load %arg9[%c0_20, %c0_21, %c0_22] : memref<1x8x128xf32, #tpu.memory_space<vmem>>, vector<1x8x128xf32>
    %35 = vector.shape_cast %34 : vector<1x8x128xf32> to vector<8x128xf32>
    %36 = vector.shape_cast %33 : vector<8x128xf32> to vector<1x8x128xf32>
    tpu.vector_store %arg9[%c0_20, %c0_21, %c0_22], %36 {strides = array<i32>} : memref<1x8x128xf32, #tpu.memory_space<vmem>>, vector<1x8x128xf32>,
    %37 = vector.extract_strided_slice %13 {offsets = [0, 0], sizes = [8, 128], strides = [1, 1]} : vector<8x256xf32> to vector<8x128xf32>
    %c0_23 = arith.constant 0 : index
    %c0_24 = arith.constant 0 : index
    %38 = vector.load %arg11[%c0_23, %c0_24] : memref<8x128xf32, #tpu.memory_space<vmem>>, vector<8x128xf32>
    tpu.vector_store %arg11[%c0_23, %c0_24], %37 {strides = array<i32>} : memref<8x128xf32, #tpu.memory_space<vmem>>, vector<8x128xf32>,
    %c15_i32 = arith.constant 15 : i32
    %39 = arith.cmpi eq, %arg1, %c15_i32 : i32
    %40 = arith.extui %39 : i1 to i32
    %c0_i32_25 = arith.constant 0 : i32
    %41 = arith.cmpi ne, %40, %c0_i32_25 : i32
    scf.if %41 {
      %c0_26 = arith.constant 0 : index
      %c0_27 = arith.constant 0 : index
      %42 = vector.load %arg10[%c0_26, %c0_27] : memref<8x128xf32, #tpu.memory_space<vmem>>, vector<8x128xf32>
      tpu.vector_store %arg10[%c0_26, %c0_27], %37 {strides = array<i32>} : memref<8x128xf32, #tpu.memory_space<vmem>>, vector<8x128xf32>,
    } else {
    }
    return
  }
  func.func @transform_0(%arg0: i32, %arg1: i32) -> (i32, i32) {
    %c0_i32 = arith.constant 0 : i32
    %c0_i32_0 = arith.constant 0 : i32
    return %arg0, %c0_i32 : i32, i32
  }
  func.func @transform_1(%arg0: i32, %arg1: i32) -> (i32, i32, i32) {
    %c0_i32 = arith.constant 0 : i32
    %c0_i32_0 = arith.constant 0 : i32
    return %arg1, %arg0, %c0_i32 : i32, i32, i32
  }
  func.func @transform_2(%arg0: i32, %arg1: i32) -> (i32, i32) {
    %c0_i32 = arith.constant 0 : i32
    %c0_i32_0 = arith.constant 0 : i32
    %c0_i32_1 = arith.constant 0 : i32
    return %c0_i32, %c0_i32_0 : i32, i32
  }
  func.func @transform_3(%arg0: i32, %arg1: i32) -> (i32, i32) {
    %c0_i32 = arith.constant 0 : i32
    %c0_i32_0 = arith.constant 0 : i32
    %c0_i32_1 = arith.constant 0 : i32
    return %c0_i32, %c0_i32_0 : i32, i32
  }
  func.func @transform_4(%arg0: i32, %arg1: i32) -> (i32, i32) {
    %c0_i32 = arith.constant 0 : i32
    %c0_i32_0 = arith.constant 0 : i32
    %c0_i32_1 = arith.constant 0 : i32
    return %c0_i32, %c0_i32_0 : i32, i32
  }
  func.func @transform_5(%arg0: i32, %arg1: i32) -> (i32, i32) {
    %c0_i32 = arith.constant 0 : i32
    %c0_i32_0 = arith.constant 0 : i32
    %c0_i32_1 = arith.constant 0 : i32
    return %c0_i32, %c0_i32_0 : i32, i32
  }
  func.func @transform_6(%arg0: i32, %arg1: i32) -> (i32, i32) {
    %c0_i32 = arith.constant 0 : i32
    %c0_i32_0 = arith.constant 0 : i32
    %c0_i32_1 = arith.constant 0 : i32
    return %c0_i32, %c0_i32_0 : i32, i32
  }
  func.func @transform_7(%arg0: i32, %arg1: i32) -> (i32, i32, i32) {
    %c0_i32 = arith.constant 0 : i32
    %c0_i32_0 = arith.constant 0 : i32
    return %arg1, %arg0, %c0_i32 : i32, i32, i32
  }
  func.func @transform_8(%arg0: i32, %arg1: i32) -> (i32, i32) {
    %c0_i32 = arith.constant 0 : i32
    %c0_i32_0 = arith.constant 0 : i32
    return %arg0, %c0_i32 : i32, i32
  }
}

</mosaic_0001>

<bundles_post_ra>
// kernel: tpu_custom_call.1
= control target key start
LH: loop header
LB: loop body
LE: loop exit
PB: predicated region body
PF: predicated region fallthrough
CT: control target
= control target key end

     0   :  { %s1861_s0 = inlined_call_operand.hbm [shape: f32[8,128], index: 0, kind: input, shape index: {}]   ;;  %s1862_s1 = inlined_call_operand.hbm [shape: f32[16,8,128], index: 1, kind: input, shape index: {}]   ;;  %s1863_s2 = inlined_call_operand.hbm [shape: f32[128,256], index: 2, kind: input, shape index: {}]   ;;  %s1864_s3 = inlined_call_operand.hbm [shape: f32[128,256], index: 3, kind: input, shape index: {}]   ;;  %s1865_s4 = inlined_call_operand.vmem [shape: f32[1,256], index: 4, kind: input, shape index: {}]   ;;  %s1866_s5 = inlined_call_operand.hbm [shape: f32[256,128], index: 5, kind: input, shape index: {}]   ;;  %s1867_s6 = inlined_call_operand.vmem [shape: f32[1,128], index: 6, kind: input, shape index: {}]   ;;  %s1868_s7 = inlined_call_operand.hbm [shape: f32[16,8,128], index: 7, kind: output, shape index: {0}]   ;;  %s1869_s8 = inlined_call_operand.hbm [shape: f32[8,128], index: 8, kind: output, shape index: {1}]  }
   0x1   :  { %1875 = sst [smem:[#allocation21_spill]] %s1861_s0 }
   0x2   :  { %1876 = sst [smem:[#allocation22_spill]] %s1863_s2 }
   0x3   :  { %1877 = sst [smem:[#allocation23_spill]] %s1868_s7 }
   0x4   :  { %1878 = sst [smem:[#allocation24_spill]] %s1869_s8 }
   0x5   :  { %14 = vsyncpa [#allocation4], 0 }
   0x6   :  { %15 = vsyncpa [#allocation7], 0 }
   0x7   :  { %17 = vsyncpa [#allocation7 + $0x1], 0 }
   0x8   :  { %18 = vsyncpa [#allocation10], 0 }
   0x9   :  { %19 = vsyncpa [#allocation5], 0 }
   0xa   :  { %21 = vsyncpa [#allocation5 + $0x1], 0 }
   0xb   :  { %22 = vsyncpa [#allocation14], 0  ;;  %s1529_s27 = smov 0   ;;  %s1531_s28 = smov 0  }
   0xc   :  { %s1533_s29 = smov 0   ;;  %s1535_s30 = smov 0  }
   0xd   :  { %s1537_s9 = smov 0   ;;  %s1539_s10 = smov 0  }
   0xe LB: > { %s1472_s11 = smov [#allocation8]   ;;  %s1560_s13 = sadd.s32 4294967295, %s1470_s10   ;;  %s1470_s10 = sphi %s1539_s10, %s28_s10   ;;  %s1466_s9 = sphi %s1537_s9, %s1911_s9   ;;  %s1462_s30 = sphi %s1535_s30, %s1910_s30   ;;  %s1458_s29 = sphi %s1533_s29, %s1909_s29   ;;  %s1454_s28 = sphi %s1531_s28, %s1908_s28   ;;  %s1450_s27 = sphi %s1529_s27, %s1907_s27  }
   0xf   : > { %s283_s12 = sshll.u32 %s1472_s11, 4  ;;  %p928_p0 = scmp.ge.s32.totalorder %s1470_s10, 1  ;;  %s1566_s12 = int_to_ptr.vmem [resolvable:$true] %s283_s12 }
  0x10   : > { %p1872_p1 = scmp.eq.s32.totalorder %s1560_s13, 0  ;;  %p258_p3 = scmp.lt.s32.totalorder %s1470_s10, 17 }
  0x11   : > { %s1473_s15 = smov [#allocation9]   ;;  %s1474_s18 = smov [#allocation3]  }
  0x12   : > { %p1568_p4 = pnand %p928_p0, %p258_p3  ;;  %s296_s16 = sshll.u32 %s1473_s15, 4  ;;  %s1574_s16 = int_to_ptr.vmem [resolvable:$true] %s296_s16 }
  0x13   : > { %s1582_s19 = sshll.u32 %s1474_s18, 4  ;;  %s1881_s2 = sld [smem:[#allocation22_spill]]  ;;  %s274_s19 = int_to_ptr.vmem [resolvable:$true] %s1582_s19 }
  0x14   : > { %s1879_s14 = scalar_select %p1568_p4, 1, 0 }
  0x15   : > { %p1109_p5 = pneg %p1568_p4 }
  0x17   : > { %p1578_p6 = pnand %p1109_p5, %p1872_p1 }
  0x19   : > { %s1204_s22 = scalar_lea.hbm %s1881_s2, 4096  ;;  %p1592_p8 = pneg %p1578_p6 }
  0x1a   : > { %p1205_p7 = scmp.ne.s32.totalorder %s1881_s2, %s1204_s22  ;;  %p1211_p11 = scmp.lt.u32.totalorder %s1204_s22, %s1881_s2 }
  0x1c   : > { %p1207_p9 = pnand %p1592_p8, %p1205_p7 }
  0x1e   : > { %p1208_p10 = pneg %p1207_p9 }
  0x20   : > { %p1213_p12 = pnand %p1211_p11, %p1208_p10 }
  0x22   : > { %1216 = shalt.err (!%p1213_p12)
}
  0x23   : > { %s1217_s15 = scalar_lea.vmem %s1566_s12, 4096  ;;  %p1225_p5 = scmp.lt.s32.totalorder %s1566_s12, %s1566_s12 }
  0x24   : > { %p1218_p13 = scmp.ne.s32.totalorder %s1566_s12, %s1217_s15  ;;  %p1226_p2 = scmp.lt.s32.totalorder %s1217_s15, %s1217_s15 }
  0x26   : > { %p1220_p0 = pnand %p1218_p13, %p1592_p8  ;;  %p1227_p7 = por %p1226_p2, %p1225_p5 }
  0x28   : > { %p1221_p3 = pneg %p1220_p0 }
  0x2a   : > { %p1228_p9 = pnand %p1227_p7, %p1221_p3 }
  0x2c   : > { %1231 = shalt.err (!%p1228_p9)
}
  0x2d   : > { %s1475_s18 = smov 256   ;;  %s1476_s20 = smov 16  }
  0x2e   : > { %1115 = dma.hbm_to_vmem [thread:$0]  (!%p1578_p6), %s1881_s2, 4096, %s1566_s12, [#allocation7], %s1475_s18, %s1475_s18, %s1476_s20  }
  0x2f   : > { %s1232_s26 = scalar_lea.hbm %s1864_s3, 4096 }
  0x30   : > { %p1233_p2 = scmp.ne.s32.totalorder %s1864_s3, %s1232_s26  ;;  %p1239_p12 = scmp.lt.u32.totalorder %s1232_s26, %s1864_s3 }
  0x32   : > { %p1235_p10 = pnand %p1233_p2, %p1592_p8 }
  0x34   : > { %p1236_p11 = pneg %p1235_p10 }
  0x36   : > { %p1241_p13 = pnand %p1239_p12, %p1236_p11 }
  0x38   : > { %1244 = shalt.err (!%p1241_p13)
}
  0x39   : > { %s1245_s12 = scalar_lea.vmem %s1574_s16, 4096  ;;  %p1253_p7 = scmp.lt.s32.totalorder %s1574_s16, %s1574_s16 }
  0x3a   : > { %p1246_p0 = scmp.ne.s32.totalorder %s1574_s16, %s1245_s12  ;;  %p1254_p9 = scmp.lt.s32.totalorder %s1245_s12, %s1245_s12 }
  0x3c   : > { %p1248_p3 = pnand %p1246_p0, %p1592_p8  ;;  %p1255_p2 = por %p1254_p9, %p1253_p7 }
  0x3e   : > { %p1249_p5 = pneg %p1248_p3 }
  0x40   : > { %p1256_p10 = pnand %p1255_p2, %p1249_p5 }
  0x42   : > { %1259 = shalt.err (!%p1256_p10)
}
  0x43   : > { %1118 = dma.hbm_to_vmem [thread:$0]  (!%p1578_p6), %s1864_s3, 4096, %s1574_s16, [#allocation10], %s1475_s18, %s1475_s18, %s1476_s20  }
  0x44   : > { %s1477_s21 = smov [#allocation11]   ;;  %s1883_s0 = sld [smem:[#allocation21_spill]] }
  0x45   : > { %s312_s22 = sshll.u32 %s1477_s21, 4  ;;  %s313_s22 = int_to_ptr.vmem [resolvable:$true] %s312_s22 }
  0x4a   : > { %s1260_s26 = scalar_lea.hbm %s1883_s0, 128 }
  0x4b   : > { %p1261_p11 = scmp.ne.s32.totalorder %s1883_s0, %s1260_s26  ;;  %p1267_p0 = scmp.lt.u32.totalorder %s1260_s26, %s1883_s0 }
  0x4d   : > { %p1263_p12 = pnand %p1261_p11, %p1592_p8 }
  0x4f   : > { %p1264_p13 = pneg %p1263_p12 }
  0x51   : > { %p1269_p3 = pnand %p1267_p0, %p1264_p13 }
  0x53   : > { %1272 = shalt.err (!%p1269_p3)
}
  0x54   : > { %s1273_s16 = scalar_lea.vmem %s274_s19, 128  ;;  %p1281_p2 = scmp.lt.s32.totalorder %s274_s19, %s274_s19 }
  0x55   : > { %p1274_p5 = scmp.ne.s32.totalorder %s274_s19, %s1273_s16  ;;  %p1282_p10 = scmp.lt.s32.totalorder %s1273_s16, %s1273_s16 }
  0x57   : > { %p1276_p7 = pnand %p1274_p5, %p1592_p8  ;;  %p1283_p1 = por %p1282_p10, %p1281_p2 }
  0x59   : > { %p1277_p9 = pneg %p1276_p7 }
  0x5b   : > { %p1284_p4 = pnand %p1283_p1, %p1277_p9 }
  0x5d   : > { %1287 = shalt.err (!%p1284_p4)
}
  0x5e   : > { %1112 = dma.hbm_to_vmem [thread:$0]  (!%p1578_p6), %s1883_s0, 128, %s274_s19, [#allocation4]  }
  0x5f   : > { %s1288_s8 = scalar_lea.hbm %s1866_s5, 4096 }
  0x60   : > { %p1289_p11 = scmp.ne.s32.totalorder %s1866_s5, %s1288_s8  ;;  %p1295_p4 = scmp.lt.u32.totalorder %s1288_s8, %s1866_s5 }
  0x62   : > { %p1291_p12 = pnand %p1289_p11, %p1592_p8 }
  0x64   : > { %p1292_p1 = pneg %p1291_p12 }
  0x66   : > { %p1297_p13 = pnand %p1295_p4, %p1292_p1 }
  0x68   : > { %1300 = shalt.err (!%p1297_p13)
}
  0x69   : > { %s1301_s11 = scalar_lea.vmem %s313_s22, 4096  ;;  %p1309_p7 = scmp.lt.s32.totalorder %s313_s22, %s313_s22 }
  0x6a   : > { %p1302_p0 = scmp.ne.s32.totalorder %s313_s22, %s1301_s11  ;;  %p1310_p9 = scmp.lt.s32.totalorder %s1301_s11, %s1301_s11 }
  0x6c   : > { %p1304_p3 = pnand %p1302_p0, %p1592_p8  ;;  %p1311_p2 = por %p1310_p9, %p1309_p7 }
  0x6e   : > { %p1305_p5 = pneg %p1304_p3 }
  0x70   : > { %p1312_p10 = pnand %p1311_p2, %p1305_p5 }
  0x72   : > { %1315 = shalt.err (!%p1312_p10)
}
  0x73   : > { %s1478_s19 = smov 128   ;;  %s1479_s25 = smov 8  }
  0x74   : > { %1121 = dma.hbm_to_vmem [thread:$0]  (!%p1578_p6), %s1866_s5, 4096, %s313_s22, [#allocation10], %s1478_s19, %s1478_s19, %s1479_s25  }
  0x75   : > { %s927_s16 = sadd.s32 4294967294, %s1470_s10   ;;  %s37_s18 = sadd.s32 1, %s1466_s9 }
  0x76   : > { %s75_s20 = sadd.s32 1, %s1458_s29  ;;  %p38_p8 = scmp.ge.s32.totalorder %s37_s18, 16 }
  0x77   : > { %p82_p11 = scmp.ne.s32.totalorder %s1458_s29, %s1454_s28  ;;  %p83_p12 = scmp.eq.s32.totalorder %s1470_s10, 0 }
  0x78   : > { %p88_p1 = scmp.ne.s32.totalorder %s1454_s28, %s1450_s27  ;;  %s1913_s18 = smov (%p38_p8, %s37_s18), 0 }
  0x79   : > { %p1683_p4 = por %p83_p12, %p82_p11  ;;  %p1885_p13 = scmp.eq.s32.totalorder %s1560_s13, 0 }
  0x7a   : > { %s70_s2 = ssub.s32 %s1466_s9, %s1913_s18  ;;  %p1887_p0 = scmp.eq.s32.totalorder %s1560_s13, 15 }
  0x7b   : > { %p1689_p6 = por %p1885_p13, %p88_p1  ;;  %p73_p5 = scmp.eq.s32.totalorder %s70_s2, 0 }
  0x7c   : > { %p1697_p3 = por %p1887_p0, %p82_p11  ;;  %p225_p7 = scmp.eq.s32.totalorder %s927_s16, 15 }
  0x7d   : > { %p1134_p9 = scmp.lt.s32.totalorder %s1470_s10, 16  ;;  %s329_s8 = sand.u32 1, %s1470_s10  }
  0x7e   : > { %s1888_s7 = scalar_select %p1697_p3, 1, 0 }
  0x7f   : > { %s1704_s21 = scalar_select %p73_p5, %s1458_s29, %s75_s20  }
  0x80   : > { %p1706_p2 = por %p225_p7, %p88_p1  ;;  %s331_s24 = sand.u32 1, %s1458_s29  }
  0x81   : > { %s935_s26 = sshll.u32 %s1466_s9, 7  ;;  %s934_s11 = sshll.u32 %s331_s24, 3 }
  0x82   : > { %s1889_s23 = scalar_select %p1706_p2, 1, 0 }
  0x83   : > { %s1715_s15 = scalar_lea.hbm %s1862_s1, %s935_s26  ;;  %p1719_p10 = pnand %p1134_p9, %p1683_p4 }
  0x84   : > { %s333_s16 = scalar_lea.vmem [#allocation6], %s934_s11  ;;  %s330_s2 = scalar_lea.sflag [#allocation7], %s329_s8 }
  0x85   : > { %s341_s20 = sshll.u32 %s333_s16, 4  ;;  %s1316_s24 = scalar_lea.hbm %s1715_s15, 128  ;;  %s1723_s20 = int_to_ptr.vmem [resolvable:$true] %s341_s20 }
  0x86   : > { %p1317_p8 = scmp.ne.s32.totalorder %s1715_s15, %s1316_s24  ;;  %p1318_p11 = pneg %p1719_p10 }
  0x87   : > { %s1321_s19 = scalar_lea.hbm %s1862_s1, 2048  ;;  %p1322_p4 = scmp.lt.u32.totalorder %s1715_s15, %s1862_s1 }
  0x88   : > { %p1319_p12 = pnand %p1318_p11, %p1317_p8  ;;  %p1323_p13 = scmp.lt.u32.totalorder %s1321_s19, %s1316_s24 }
  0x89   : > { %p1325_p5 = scmp.lt.u32.totalorder %s1316_s24, %s1715_s15 }
  0x8a   : > { %p1320_p1 = pneg %p1319_p12  ;;  %p1324_p0 = por %p1323_p13, %p1322_p4 }
  0x8c   : > { %p1326_p7 = por %p1325_p5, %p1324_p0 }
  0x8e   : > { %p1327_p9 = pnand %p1326_p7, %p1320_p1 }
  0x90   : > { %1330 = shalt.err (!%p1327_p9)
}
  0x91   : > { %s1331_s8 = scalar_lea.vmem %s1723_s20, 128  ;;  %s1480_s11 = smov [#allocation6]  }
  0x92   : > { %p1332_p8 = scmp.ne.s32.totalorder %s1723_s20, %s1331_s8  ;;  %s1336_s16 = sshll.u32 %s1480_s11, 4  ;;  %s1337_s16 = int_to_ptr.vmem [resolvable:$false] %s1336_s16 }
  0x93   : > { %s1338_s0 = scalar_lea.vmem %s1337_s16, 256  ;;  %p1339_p3 = scmp.lt.s32.totalorder %s1723_s20, %s1337_s16 }
  0x94   : > { %p1334_p12 = pnand %p1332_p8, %p1318_p11  ;;  %p1340_p4 = scmp.lt.s32.totalorder %s1338_s0, %s1331_s8 }
  0x96   : > { %p1335_p2 = pneg %p1334_p12  ;;  %p1341_p13 = por %p1340_p4, %p1339_p3 }
  0x98   : > { %p1342_p0 = pnand %p1341_p13, %p1335_p2 }
  0x9a   : > { %1345 = shalt.err (!%p1342_p0)
}
  0x9b   : > { %1125 = dma.hbm_to_vmem [thread:$0]  (!%p1719_p10), %s1715_s15, 128, %s1723_s20, %s330_s2  }
  0x9c   : > { %p1891_p1 = scmp.ne.s32.totalorder %s1879_s14, 0 }
  0x9d   : > { %p1892_p11 = scmp.eq.s32.totalorder (!%p1891_p1), %s1560_s13, 0 }
  0x9e   : > { %350 = sbr.rel (%p1891_p1) target bundleno = 1063 (0x427), region = 48 }
  0xa5   : > { %1425 = dma.done.wait (%p1892_p11), [#allocation4], 128   ;;  %p1893_p5 = pmov %p1892_p11 }
  0xa6   : > { %s356_s24 = sand.u32 1, %s1560_s13   ;;  %s358_s17 = sand.u32 1, %s1454_s28  }
  0xa7   : > { %1427 = vsyncadd (%p1893_p5), [#allocation4], 4294967168  ;;  %s1760_s12 = sshll.u32 %s358_s17, 3  ;;  %s357_s15 = scalar_lea.sflag [#allocation7], %s356_s24 }
  0xa8   : > { %s360_s20 = scalar_lea.vmem [#allocation6], %s1760_s12 }
  0xa9   : > { %1429 = dma.done.wait (%p1689_p6), %s357_s15, 128  }
  0xaa   : > { %1431 = vsyncadd (%p1689_p6), %s357_s15, 4294967168  ;;  %p1894_p3 = pmov %p1893_p5 }
  0xac   : > { %1433 = dma.done.wait (%p1894_p3), [#allocation7], 4096   ;;  %p1895_p2 = pmov %p1894_p3 }
  0xae   : > { %1435 = vsyncadd (%p1895_p2), [#allocation7], 4294963200  ;;  %p1896_p10 = pmov %p1895_p2 }
  0xaf   : > { %p1897_p7 = pmov %p1895_p2 }
  0xb0   : > { %1437 = dma.done.wait (%p1896_p10), [#allocation10], 8192  }
  0xb1   : > { %1439 = vsyncadd (%p1897_p7), [#allocation10], 4294959104  ;;  %s402_s14 = scalar_lea.vmem [#allocation12], %s1760_s12  ;;  %p943_p9 = scmp.ne.s32.totalorder %s1462_s30, 0 }
  0xb2   : > { %v409_v0 = vld [vmem:[#allocation3] sm:$0xff] (!%p943_p9) }
  0xb3   : > { %408 = sbr.rel (%p943_p9) target bundleno = 186 (0xba), region = 72  ;;  %410 = vst [vmem:[#allocation2] sm:$0xff] (!%p943_p9), %v409_v0 }
  0xba PF: > { %v446_v1 = vld [vmem:[#allocation9 + $0x8] sm:$0xff]  ;;  %v448_v2 = vld [vmem:[#allocation9 + $0x18] sm:$0xff]  ;;  %v445_v3 = vld [vmem:[#allocation9] sm:$0xff]  ;;  %v1481_v8 = vmov 0.0   ;;  %p945_p6 = scmp.ne.s32.totalorder %s1462_s30, 15 }
  0xbb   : > { %v987_v4 = vpack.c.bf16 %v448_v2, %v446_v1  ;;  %v447_v5 = vld [vmem:[#allocation9 + $0x10] sm:$0xff]  ;;  %v450_v6 = vld [vmem:[#allocation9 + $0x28] sm:$0xff]  ;;  %v452_v7 = vld [vmem:[#allocation9 + $0x38] sm:$0xff]  ;;  %541 = vmatprep.mubr.f32.mxu0 %v1481_v8 }
  0xbc   : > { %v989_v9 = vpack.c.bf16 %v447_v5, %v445_v3  ;;  %v991_v10 = vpack.c.bf16 %v452_v7, %v450_v6  ;;  %v449_v11 = vld [vmem:[#allocation9 + $0x20] sm:$0xff]  ;;  %v451_v12 = vld [vmem:[#allocation9 + $0x30] sm:$0xff]  ;;  %v454_v13 = vld [vmem:[#allocation9 + $0x48] sm:$0xff] }
  0xbd   : > { %988 = vmatprep.subr.bf16.mxu0 %v987_v4  ;;  %v456_v14 = vld [vmem:[#allocation9 + $0x58] sm:$0xff]  ;;  %v993_v15 = vpack.c.bf16 %v451_v12, %v449_v11  ;;  %v453_v17 = vld [vmem:[#allocation9 + $0x40] sm:$0xff]  ;;  %v455_v18 = vld [vmem:[#allocation9 + $0x50] sm:$0xff] }
  0xbe   : > { %990 = vmatpush1.bf16.msra.mxu0 %v989_v9  ;;  %v995_v16 = vpack.c.bf16 %v456_v14, %v454_v13  ;;  %v458_v19 = vld [vmem:[#allocation9 + $0x68] sm:$0xff]  ;;  %v460_v20 = vld [vmem:[#allocation9 + $0x78] sm:$0xff]  ;;  %v997_v21 = vpack.c.bf16 %v455_v18, %v453_v17  ;;  %v457_v23 = vld [vmem:[#allocation9 + $0x60] sm:$0xff] }
  0xbf   : > { %992 = vmatprep.subr.bf16.mxu0 %v991_v10  ;;  %v999_v22 = vpack.c.bf16 %v460_v20, %v458_v19  ;;  %v459_v24 = vld [vmem:[#allocation9 + $0x70] sm:$0xff]  ;;  %v462_v25 = vld [vmem:[#allocation9 + $0x88] sm:$0xff]  ;;  %v464_v26 = vld [vmem:[#allocation9 + $0x98] sm:$0xff] }
  0xc0   : > { %v1001_v27 = vpack.c.bf16 %v459_v24, %v457_v23  ;;  %v1003_v28 = vpack.c.bf16 %v464_v26, %v462_v25  ;;  %v461_v29 = vld [vmem:[#allocation9 + $0x80] sm:$0xff]  ;;  %v463_v30 = vld [vmem:[#allocation9 + $0x90] sm:$0xff]  ;;  %v466_v31 = vld [vmem:[#allocation9 + $0xa8] sm:$0xff] }
  0xc1   : > { %v468_v32 = vld [vmem:[#allocation9 + $0xb8] sm:$0xff]  ;;  %v1005_v33 = vpack.c.bf16 %v463_v30, %v461_v29  ;;  %v465_v35 = vld [vmem:[#allocation9 + $0xa0] sm:$0xff]  ;;  %v467_v36 = vld [vmem:[#allocation9 + $0xb0] sm:$0xff] }
  0xc2   : > { %994 = vmatpush1.bf16.msra.mxu0 %v993_v15  ;;  %v1007_v34 = vpack.c.bf16 %v468_v32, %v466_v31  ;;  %v470_v37 = vld [vmem:[#allocation9 + $0xc8] sm:$0xff]  ;;  %v472_v38 = vld [vmem:[#allocation9 + $0xd8] sm:$0xff]  ;;  %v1009_v39 = vpack.c.bf16 %v467_v36, %v465_v35  ;;  %v469_v40 = vld [vmem:[#allocation9 + $0xc0] sm:$0xff] }
  0xc3   : > { %996 = vmatprep.subr.bf16.mxu0 %v995_v16  ;;  %v1011_v41 = vpack.c.bf16 %v472_v38, %v470_v37  ;;  %v471_v42 = vld [vmem:[#allocation9 + $0xd0] sm:$0xff]  ;;  %v474_v43 = vld [vmem:[#allocation9 + $0xe8] sm:$0xff]  ;;  %v476_v44 = vld [vmem:[#allocation9 + $0xf8] sm:$0xff] }
  0xc4   : > { %v649_v45 = vld [vmem:[#allocation11 + $0x80] sm:$0xff]  ;;  %v650_v46 = vld [vmem:[#allocation11 + $0x88] sm:$0xff]  ;;  %v651_v50 = vld [vmem:[#allocation11 + $0x90] sm:$0xff]  ;;  %v1013_v52 = vpack.c.bf16 %v471_v42, %v469_v40  ;;  %v1015_v58 = vpack.c.bf16 %v476_v44, %v474_v43 }
  0xc5   : > { %v633_v47 = vld [vmem:[#allocation11] sm:$0xff]  ;;  %v1051_v48 = vpack.c.bf16 %v650_v46, %v649_v45  ;;  %v634_v49 = vld [vmem:[#allocation11 + $0x8] sm:$0xff]  ;;  %v652_v51 = vld [vmem:[#allocation11 + $0x98] sm:$0xff] }
  0xc6   : > { %998 = vmatpush1.bf16.msra.mxu0 %v997_v21  ;;  %v1053_v53 = vpack.c.bf16 %v634_v49, %v633_v47  ;;  %v1055_v54 = vpack.c.bf16 %v652_v51, %v651_v50  ;;  %v635_v55 = vld [vmem:[#allocation11 + $0x10] sm:$0xff]  ;;  %v636_v56 = vld [vmem:[#allocation11 + $0x18] sm:$0xff]  ;;  %v653_v57 = vld [vmem:[#allocation11 + $0xa0] sm:$0xff] }
  0xc7   : > { %1000 = vmatprep.subr.bf16.mxu0 %v999_v22  ;;  %v473_v59 = vld [vmem:[#allocation9 + $0xe0] sm:$0xff]  ;;  %v475_v60 = vld [vmem:[#allocation9 + $0xf0] sm:$0xff]  ;;  %1052 = vmatprep.subr.bf16.mxu1 %v1051_v48  ;;  %v654_v61 = vld [vmem:[#allocation11 + $0xa8] sm:$0xff]  ;;  %v1057_v0 = vpack.c.bf16 %v636_v56, %v635_v55 }
  0xc8   : > { %v414_v62 = vld [vmem:[#allocation8 + $0x8] sm:$0xff]  ;;  %v416_v63 = vld [vmem:[#allocation8 + $0x18] sm:$0xff]  ;;  %1054 = vmatpush3.bf16.msra.mxu1 %v1053_v53  ;;  %v1059_v1 = vpack.c.bf16 %v654_v61, %v653_v57  ;;  %v637_v2 = vld [vmem:[#allocation11 + $0x20] sm:$0xff]  ;;  %v1017_v4 = vpack.c.bf16 %v475_v60, %v473_v59 }
  0xc9   : > { %1056 = vmatprep.subr.bf16.mxu1 %v1055_v54  ;;  %v638_v3 = vld [vmem:[#allocation11 + $0x28] sm:$0xff]  ;;  %v655_v5 = vld [vmem:[#allocation11 + $0xb0] sm:$0xff]  ;;  %v656_v6 = vld [vmem:[#allocation11 + $0xb8] sm:$0xff]  ;;  %v1019_v7 = vpack.c.bf16 %v416_v63, %v414_v62 }
  0xca   : > { %1002 = vmatpush1.bf16.msra.mxu0 %v1001_v27  ;;  %v413_v9 = vld [vmem:[#allocation8] sm:$0xff]  ;;  %v415_v10 = vld [vmem:[#allocation8 + $0x10] sm:$0xff]  ;;  %v418_v11 = vld [vmem:[#allocation8 + $0x28] sm:$0xff]  ;;  %v1061_v13 = vpack.c.bf16 %v638_v3, %v637_v2  ;;  %v1063_v14 = vpack.c.bf16 %v656_v6, %v655_v5 }
  0xcb   : > { %1004 = vmatprep.subr.bf16.mxu0 %v1003_v28  ;;  %v420_v12 = vld [vmem:[#allocation8 + $0x38] sm:$0xff]  ;;  %v639_v15 = vld [vmem:[#allocation11 + $0x30] sm:$0xff]  ;;  %v412_v17 = vld [vmem:[#allocation2] sm:$0xff]  ;;  %v1021_v18 = vpack.c.bf16 %v415_v10, %v413_v9 }
  0xcc   : > { %1058 = vmatpush3.bf16.msra.mxu1 %v1057_v0  ;;  %v640_v16 = vld [vmem:[#allocation11 + $0x38] sm:$0xff]  ;;  %v657_v19 = vld [vmem:[#allocation11 + $0xc0] sm:$0xff]  ;;  %v658_v20 = vld [vmem:[#allocation11 + $0xc8] sm:$0xff]  ;;  %v1023_v21 = vpack.c.bf16 %v420_v12, %v418_v11 }
  0xcd   : > { %1060 = vmatprep.subr.bf16.mxu1 %v1059_v1  ;;  %v417_v22 = vld [vmem:[#allocation8 + $0x20] sm:$0xff]  ;;  %v419_v23 = vld [vmem:[#allocation8 + $0x30] sm:$0xff]  ;;  %v422_v24 = vld [vmem:[#allocation8 + $0x48] sm:$0xff]  ;;  %v1065_v26 = vpack.c.bf16 %v640_v16, %v639_v15  ;;  %v1067_v27 = vpack.c.bf16 %v658_v20, %v657_v19 }
  0xce   : > { %1006 = vmatpush1.bf16.msra.mxu0 %v1005_v33  ;;  %v424_v25 = vld [vmem:[#allocation8 + $0x58] sm:$0xff]  ;;  %v641_v28 = vld [vmem:[#allocation11 + $0x40] sm:$0xff]  ;;  %v642_v29 = vld [vmem:[#allocation11 + $0x48] sm:$0xff]  ;;  %v1025_v30 = vpack.c.bf16 %v419_v23, %v417_v22 }
  0xcf   : > { %1008 = vmatprep.subr.bf16.mxu0 %v1007_v34  ;;  %v659_v31 = vld [vmem:[#allocation11 + $0xd0] sm:$0xff]  ;;  %v660_v32 = vld [vmem:[#allocation11 + $0xd8] sm:$0xff]  ;;  %v1027_v33 = vpack.c.bf16 %v424_v25, %v422_v24  ;;  %v421_v34 = vld [vmem:[#allocation8 + $0x40] sm:$0xff]  ;;  %v1069_v38 = vpack.c.bf16 %v642_v29, %v641_v28 }
  0xd0   : > { %1062 = vmatpush3.bf16.msra.mxu1 %v1061_v13  ;;  %v423_v35 = vld [vmem:[#allocation8 + $0x50] sm:$0xff]  ;;  %v426_v36 = vld [vmem:[#allocation8 + $0x68] sm:$0xff]  ;;  %v428_v37 = vld [vmem:[#allocation8 + $0x78] sm:$0xff] }
  0xd1   : > { %1064 = vmatprep.subr.bf16.mxu1 %v1063_v14  ;;  %v643_v40 = vld [vmem:[#allocation11 + $0x50] sm:$0xff]  ;;  %v1029_v42 = vpack.c.bf16 %v423_v35, %v421_v34  ;;  %v661_v43 = vld [vmem:[#allocation11 + $0xe0] sm:$0xff]  ;;  %v662_v44 = vld [vmem:[#allocation11 + $0xe8] sm:$0xff] }
  0xd2   : > { %1010 = vmatpush1.bf16.msra.mxu0 %v1009_v39  ;;  %v1071_v39 = vpack.c.bf16 %v660_v32, %v659_v31  ;;  %v425_v45 = vld [vmem:[#allocation8 + $0x60] sm:$0xff]  ;;  %v427_v46 = vld [vmem:[#allocation8 + $0x70] sm:$0xff]  ;;  %v430_v47 = vld [vmem:[#allocation8 + $0x88] sm:$0xff]  ;;  %v1075_v50 = vpack.c.bf16 %v662_v44, %v661_v43 }
  0xd3   : > { %1012 = vmatprep.subr.bf16.mxu0 %v1011_v41  ;;  %v644_v41 = vld [vmem:[#allocation11 + $0x58] sm:$0xff]  ;;  %v645_v51 = vld [vmem:[#allocation11 + $0x60] sm:$0xff]  ;;  %v1033_v53 = vpack.c.bf16 %v427_v46, %v425_v45  ;;  %v431_v56 = vld [vmem:[#allocation8 + $0x90] sm:$0xff] }
  0xd4   : > { %1066 = vmatpush3.bf16.msra.mxu1 %v1065_v26  ;;  %v432_v48 = vld [vmem:[#allocation8 + $0x98] sm:$0xff]  ;;  %v1073_v49 = vpack.c.bf16 %v644_v41, %v643_v40  ;;  %v429_v55 = vld [vmem:[#allocation8 + $0x80] sm:$0xff]  ;;  %v434_v57 = vld [vmem:[#allocation8 + $0xa8] sm:$0xff] }
  0xd5   : > { %1068 = vmatprep.subr.bf16.mxu1 %v1067_v27  ;;  %v1035_v54 = vpack.c.bf16 %v432_v48, %v430_v47  ;;  %v1037_v60 = vpack.c.bf16 %v431_v56, %v429_v55  ;;  %v433_v62 = vld [vmem:[#allocation8 + $0xa0] sm:$0xff]  ;;  %v435_v63 = vld [vmem:[#allocation8 + $0xb0] sm:$0xff]  ;;  %v438_v0 = vld [vmem:[#allocation8 + $0xc8] sm:$0xff] }
  0xd6   : > { %1014 = vmatpush1.bf16.msra.mxu0 %v1013_v52  ;;  %v646_v52 = vld [vmem:[#allocation11 + $0x68] sm:$0xff]  ;;  %v440_v1 = vld [vmem:[#allocation8 + $0xd8] sm:$0xff]  ;;  %v1041_v2 = vpack.c.bf16 %v435_v63, %v433_v62  ;;  %v439_v5 = vld [vmem:[#allocation8 + $0xd0] sm:$0xff] }
  0xd7   : > { %1016 = vmatprep.subr.bf16.mxu0 %v1015_v58  ;;  %v436_v58 = vld [vmem:[#allocation8 + $0xb8] sm:$0xff]  ;;  %v1077_v59 = vpack.c.bf16 %v646_v52, %v645_v51  ;;  %v1043_v3 = vpack.c.bf16 %v440_v1, %v438_v0  ;;  %v442_v6 = vld [vmem:[#allocation8 + $0xe8] sm:$0xff]  ;;  %v441_v11 = vld [vmem:[#allocation8 + $0xe0] sm:$0xff] }
  0xd8   : > { %1070 = vmatpush3.bf16.msra.mxu1 %v1069_v38  ;;  %v1039_v61 = vpack.c.bf16 %v436_v58, %v434_v57  ;;  %v443_v12 = vld [vmem:[#allocation8 + $0xf0] sm:$0xff]  ;;  %v664_v16 = vld [vmem:[#allocation11 + $0xf8] sm:$0xff]  ;;  %v619_v24 = vld [vmem:[%s1865_s4] sm:$0x3] }
  0xd9   : > { %1072 = vmatprep.subr.bf16.mxu1 %v1071_v39  ;;  %v1049_v13 = vpack.c.bf16 %v443_v12, %v441_v11  ;;  %v411_v14 = vld [vmem:[%s360_s20] sm:$0xff]  ;;  %v944_v35 = vld [vmem:[%s1867_s6] ss:$0 sm:$0xff] }
  0xda   : > { %1018 = vmatpush1.bf16.msra.mxu0 %v1017_v4  ;;  %v437_v4 = vld [vmem:[#allocation8 + $0xc0] sm:$0xff]  ;;  %v663_v15 = vld [vmem:[#allocation11 + $0xf0] sm:$0xff]  ;;  %v648_v19 = vld [vmem:[#allocation11 + $0x78] sm:$0xff] }
  0xdb   : > { %1020 = vmatprep.subr.bf16.mxu0 %v1019_v7  ;;  %v444_v7 = vld [vmem:[#allocation8 + $0xf8] sm:$0xff]  ;;  %v1045_v9 = vpack.c.bf16 %v439_v5, %v437_v4 }
  0xdc   : > { %1074 = vmatpush3.bf16.msra.mxu1 %v1073_v49  ;;  %v1047_v10 = vpack.c.bf16 %v444_v7, %v442_v6 }
  0xdd   : > { %542 = vmatmul.mubr.f32.vlgmr.msra.gmra.mrb[0].mxu0 %v412_v17  ;;  %1076 = vmatprep.subr.bf16.mxu1 %v1075_v50  ;;  %v1079_v17 = vpack.c.bf16 %v664_v16, %v663_v15 }
  0xde   : > { %1022 = vmatpush1.bf16.msra.mxu0 %v1021_v18  ;;  %612 = vmatprep.mubr.f32.mxu0 %v1481_v8  ;;  %v1031_v8 = vpack.c.bf16 %v428_v37, %v426_v36  ;;  %v647_v18 = vld [vmem:[#allocation11 + $0x70] sm:$0xff] }
  0xdf   : > { %1024 = vmatprep.subr.bf16.mxu0 %v1023_v21  ;;  %v1081_v20 = vpack.c.bf16 %v648_v19, %v647_v18  ;;  %v621_v21 = vlaneseq }
  0xe0   : > { %1078 = vmatpush3.bf16.msra.mxu1 %v1077_v59 }
  0xe1   : > { %1080 = vmatprep.subr.bf16.mxu1 %v1079_v17  ;;  %v622_v22 = vshrl.u32 %v621_v21, 7  ;;  %v743_v32 = vand.u32 127, %v621_v21 }
  0xe2   : > { %1026 = vmatpush1.bf16.msra.mxu0 %v1025_v30 }
  0xe3   : > { %1028 = vmatprep.subr.bf16.mxu0 %v1027_v33  ;;  %v623_v23 = vsub.s32 0, %v622_v22  ;;  %v627_v25 = vsub.s32 1, %v622_v22  ;;  %vm744_vm0 = vcmp.lt.s32.totalorder %v743_v32, 32 }
  0xe4   : > { %1082 = vmatpush3.bf16.msra.mxu1 %v1081_v20 }
  0xe5   : > { %v624_v26 = vrot.slane %v619_v24, %v623_v23  ;;  %v628_v27 = vrot.slane %v619_v24, %v627_v25 }
  0xe6   : > { %1030 = vmatpush1.bf16.msra.mxu0 %v1029_v42 }
  0xe7   : > { %1032 = vmatprep.subr.bf16.mxu0 %v1031_v8 }
  0xea   : > { %1034 = vmatpush1.bf16.msra.mxu0 %v1033_v53 }
  0xeb   : > { %1036 = vmatprep.subr.bf16.mxu0 %v1035_v54 }
  0xee   : > { %1038 = vmatpush1.bf16.msra.mxu0 %v1037_v60 }
  0xef   : > { %1040 = vmatprep.subr.bf16.mxu0 %v1039_v61 }
  0xf2   : > { %1042 = vmatpush1.bf16.msra.mxu0 %v1041_v2 }
  0xf3   : > { %1044 = vmatprep.subr.bf16.mxu0 %v1043_v3 }
  0xf6   : > { %1046 = vmatpush1.bf16.msra.mxu0 %v1045_v9 }
  0xf7   : > { %1048 = vmatprep.subr.bf16.mxu0 %v1047_v10 }
  0xfa   : > { %1050 = vmatpush1.bf16.msra.mxu0 %v1049_v13 }
  0xfd   : > { %613 = vmatmul.mubr.f32.vlgmr.msra.gmra.mrb[0].mxu0 %v411_v14 }
 0x1d0   : > { %v614_v28 = vpop.f32.mrb[0].mxu0 }
 0x1d1   : > { %v631_v29 = vadd.f32 %v624_v26, %v614_v28  ;;  %v616_v30 = vpop.f32.mrb[1].mxu0 }
 0x1d2   : > { %v632_v31 = vadd.f32 %v628_v27, %v616_v30 }
 0x1d3   : > { %757 = vst [vmem:[#allocation2] sm:$0xff] %v631_v29  ;;  %762 = vst [vmem:[#allocation13] sm:$0xff] (!%p945_p6), %v631_v29 }
 0x1d4   : > { %736 = vmatprep.mubr.f32.mxu1 %v632_v31 }
 0x1d5   : > { %737 = vmatmul.mubr.f32.vlgmr.msra.gmra.mrb[0].mxu1 %v631_v29 }
 0x2a8   : > { %v984_v33 = vpop.f32.mrb[0].mxu1 }
 0x2a9   : > { %v985_v34 = vpop.f32.mrb[1].mxu1 }
 0x2aa   : > { %v986_v36 = vadd.f32 %v985_v34, %v984_v33 }
 0x2ac   : > { %v739_v37 = vadd.f32 %v986_v36, %v944_v35 }
 0x2ae   : > { %v745_v38 = vsel %vm744_vm0, %v739_v37, -1e+30 }
 0x2af   : > { %746 = vmax.xlane.f32.xlu0 %v745_v38 }
 0x33c   : > { %v747_v39 = vpop.xlane.xlu0 %746 }
 0x33d   : > { %v748_v40 = vsub.f32 %v745_v38, %v747_v39 }
 0x33f   : > { %v749_v41 = vmul.f32 1.442695, %v748_v40 }
 0x341   : > { %1200 = vpow2.f32 %v749_v41 }
 0x34b   : > { %v1201_v42 = vpop.eup %1200 }
 0x34c   : > { %751 = vadd.xlane.f32.xlu0 %v1201_v42 }
 0x3d9   : > { %v752_v43 = vpop.xlane.xlu0 %751 }
 0x3da   : > { %1202 = vlog2.f32 %v752_v43 }
 0x3e3   : > { %761 = sbr.rel (%p945_p6) target bundleno = 1002 (0x3ea), region = 76 }
 0x3e4   : > { %v1203_v44 = vpop.eup %1202 }
 0x3e5   : > { %v754_v8 = vmul.f32 0.6931472, %v1203_v44 }
 0x3e7   : > { %v755_v45 = vsub.f32 %v748_v40, %v754_v8 }
 0x3e9   : > { %756 = vst [vmem:[%s402_s14] sm:$0xff] %v755_v45 }
 0x3ea PF: > { %s947_s25 = sshll.u32 %s1462_s30, 7  ;;  %s1898_s16 = sld [smem:[#allocation23_spill]] }
 0x3eb   : > { %s778_s24 = sshll.u32 %s402_s14, 4  ;;  %s764_s15 = scalar_lea.sflag [#allocation5], %s358_s17  ;;  %s779_s24 = int_to_ptr.vmem [resolvable:$true] %s778_s24 }
 0x3ec   : > { %s1346_s20 = scalar_lea.vmem %s779_s24, 128  ;;  %p1899_p12 = scmp.ne.s32.totalorder %s1888_s7, 0 }
 0x3ed   : > { %p1347_p8 = scmp.ne.s32.totalorder %s779_s24, %s1346_s20  ;;  %s1482_s22 = smov [#allocation12]  }
 0x3ee   : > { %s1350_s2 = sshll.u32 %s1482_s22, 4  ;;  %s1351_s2 = int_to_ptr.vmem [resolvable:$false] %s1350_s2 }
 0x3ef   : > { %p1348_p4 = pnand %p1347_p8, %p1899_p12  ;;  %s1352_s26 = scalar_lea.vmem %s1351_s2, 256 }
 0x3f0   : > { %s1794_s0 = scalar_lea.hbm %s1898_s16, %s947_s25  ;;  %p1353_p0 = scmp.lt.s32.totalorder %s779_s24, %s1351_s2 }
 0x3f1   : > { %p1349_p13 = pneg %p1348_p4  ;;  %p1354_p1 = scmp.lt.s32.totalorder %s1352_s26, %s1346_s20 }
 0x3f3   : > { %p1355_p11 = por %p1354_p1, %p1353_p0 }
 0x3f5   : > { %p1356_p5 = pnand %p1355_p11, %p1349_p13 }
 0x3f7   : > { %1359 = shalt.err (!%p1356_p5)
}
 0x3f8   : > { %s1360_s30 = scalar_lea.hbm %s1794_s0, 128  ;;  %s1364_s14 = scalar_lea.hbm %s1898_s16, 2048 }
 0x3f9   : > { %p1361_p3 = scmp.ne.s32.totalorder %s1794_s0, %s1360_s30  ;;  %p1365_p7 = scmp.lt.u32.totalorder %s1794_s0, %s1898_s16 }
 0x3fa   : > { %p1366_p9 = scmp.lt.u32.totalorder %s1364_s14, %s1360_s30  ;;  %p1368_p8 = scmp.lt.u32.totalorder %s1360_s30, %s1794_s0 }
 0x3fb   : > { %p1362_p2 = pnand %p1361_p3, %p1899_p12 }
 0x3fc   : > { %p1367_p6 = por %p1366_p9, %p1365_p7 }
 0x3fd   : > { %p1363_p10 = pneg %p1362_p2 }
 0x3fe   : > { %p1369_p4 = por %p1368_p8, %p1367_p6 }
 0x400   : > { %p1370_p13 = pnand %p1369_p4, %p1363_p10 }
 0x402   : > { %1373 = shalt.err (!%p1370_p13)
}
 0x403   : > { %1103 = dma.vmem_to_hbm [thread:$0]  (%p1899_p12), %s779_s24, 128, %s1794_s0, %s764_s15  }
 0x404   : > { %s1483_s8 = smov [#allocation13]   ;;  %p1900_p1 = scmp.eq.s32.totalorder %s1560_s13, 15 }
 0x405   : > { %s791_s11 = sshll.u32 %s1483_s8, 4  ;;  %s792_s11 = int_to_ptr.vmem [resolvable:$true] %s791_s11 }
 0x406   : > { %s1374_s20 = scalar_lea.vmem %s792_s11, 128  ;;  %p1381_p3 = scmp.lt.s32.totalorder %s792_s11, %s792_s11 }
 0x407   : > { %p1375_p0 = scmp.ne.s32.totalorder %s792_s11, %s1374_s20  ;;  %p1382_p2 = scmp.lt.s32.totalorder %s1374_s20, %s1374_s20 }
 0x409   : > { %p1376_p11 = pnand %p1375_p0, %p1900_p1  ;;  %p1383_p7 = por %p1382_p2, %p1381_p3 }
 0x40b   : > { %p1377_p5 = pneg %p1376_p11 }
 0x40d   : > { %p1384_p9 = pnand %p1383_p7, %p1377_p5 }
 0x40f   : > { %1387 = shalt.err (!%p1384_p9)
}
 0x410   : > { %s1901_s26 = sld [smem:[#allocation24_spill]]  ;;  %p1902_p10 = pmov %p1900_p1 }
 0x416   : > { %s1388_s7 = scalar_lea.hbm %s1901_s26, 128 }
 0x417   : > { %p1389_p12 = scmp.ne.s32.totalorder %s1901_s26, %s1388_s7  ;;  %p1394_p4 = scmp.lt.u32.totalorder %s1388_s7, %s1901_s26 }
 0x419   : > { %p1390_p6 = pnand %p1389_p12, %p1902_p10 }
 0x41b   : > { %p1391_p8 = pneg %p1390_p6 }
 0x41d   : > { %p1396_p13 = pnand %p1394_p4, %p1391_p8 }
 0x41f   : > { %1399 = shalt.err (!%p1396_p13)
}
 0x420   : > { %p1903_p0 = pmov %p1900_p1 }
 0x422   : > { %1105 = dma.vmem_to_hbm [thread:$0]  (%p1903_p0), %s792_s11, 128, %s1901_s26, [#allocation14]  }
 0x423   : > { %p1904_p1 = pmov %p1903_p0 }
 0x424   : > { %p1905_p11 = pmov %p1903_p0 }
 0x425   : > { %1441 = dma.done.wait (%p1904_p1), [#allocation14], 128  }
 0x426   : > { %1443 = vsyncadd (%p1905_p11), [#allocation14], 4294967168 }
 0x427 PF: > { %p1141_p5 = scmp.ge.s32.totalorder %s1470_s10, 2  ;;  %s807_s14 = sand.u32 1, %s1450_s27  }
 0x428   : > { %p1906_p3 = scmp.ne.s32.totalorder %s1889_s23, 0  ;;  %s808_s19 = scalar_lea.sflag [#allocation5], %s807_s14 }
 0x42a   : > { %p1127_p2 = pnand %p1141_p5, %p1906_p3 }
 0x42c   : > { %1445 = dma.done.wait (!%p1127_p2), %s808_s19, 128  }
 0x42d   : > { %1447 = vsyncadd (!%p1127_p2), %s808_s19, 4294967168  ;;  %s28_s10 = sadd.s32 1, %s1470_s10   ;;  %s1907_s27 = smov %s1454_s28 }
 0x42e   : > { %p25_p7 = scmp.ge.s32.totalorder %s28_s10, 18   ;;  %s1908_s28 = smov %s1458_s29 }
 0x42f   : > { %s1909_s29 = smov %s1704_s21  ;;  %s1910_s30 = smov %s1466_s9 }
 0x430   : > { %s1911_s9 = smov %s1913_s18  ;;  %27 = sbr.rel (!%p25_p7) target bundleno = 14 (0xe), region = 128 }
 0x437   :  { %813 = vsyncpa [#allocation4], 1 }
 0x438   :  { %815 = vsyncpa [#allocation4 + $0x1], 1 }
 0x439   :  { %816 = vsyncpa [#allocation7], 1 }
 0x43a   :  { %818 = vsyncpa [#allocation7 + $0x1], 1 }
 0x43b   :  { %819 = vsyncpa [#allocation10], 1 }
 0x43c   :  { %820 = vsyncpa [#allocation5], 1 }
 0x43d   :  { %822 = vsyncpa [#allocation5 + $0x1], 1 }
 0x43e   :  { %823 = vsyncpa [#allocation14], 1 }

</bundles_post_ra>
